<compile_context>
chip_gen: v5e
topology: v5e:2x2
jax: 0.10.0
libtpu: 0.0.40
codegen_flags: <defaults>
</compile_context>

<pallas_src>
import math
import functools

import jax
import jax.numpy as jnp
from jax.experimental import pallas as pl
from jax.experimental.pallas import tpu as pltpu


# ----------------------------------------------------------------------------
# Buffer setup (plain JAX glue, mirrors the PyTorch __init__)
# ----------------------------------------------------------------------------
def make_positional_encoding(d_model: int, max_len: int = 5000) -> jnp.ndarray:
    """pe[:, 0, 0::2] = sin(pos * div), pe[:, 0, 1::2] = cos(pos * div)."""
    position = jnp.arange(max_len, dtype=jnp.float32)[:, None]          # (L, 1)
    div_term = jnp.exp(
        jnp.arange(0, d_model, 2, dtype=jnp.float32)
        * (-math.log(10000.0) / d_model)
    )                                                                    # (D/2,)
    pe = jnp.zeros((max_len, 1, d_model), dtype=jnp.float32)
    pe = pe.at[:, 0, 0::2].set(jnp.sin(position * div_term))
    pe = pe.at[:, 0, 1::2].set(jnp.cos(position * div_term))
    return pe


# ----------------------------------------------------------------------------
# Pallas kernel: x[s, b, :] + pe[s, :]  (batch broadcast) + inverted dropout
#   x is presented flattened as [S, B*D]; pe as dense [max_len, D].
# ----------------------------------------------------------------------------
def _ape_kernel(seed_ref, x_ref, pe_ref, o_ref, *,
                batch: int, row_width: int, seq_tile: int,
                dropout_p: float, training: bool):
    pe_tile = pe_ref[...]                                  # (seq_tile, D)
    if batch > 1:
        # Repeat along the lane axis so pe matches the flattened [.., B*D] row.
        pe_tile = jnp.tile(pe_tile, (1, batch))            # (seq_tile, B*D)

    y = x_ref[...] + pe_tile                               # (seq_tile, B*D)

    if training and dropout_p > 0.0:
        # Counter-based hash dropout: hash the absolute element index so the
        # mask does not depend on the tiling, and compare against an integer
        # threshold (no float convert / shift-to-float path).
        i = pl.program_id(0)
        rows = jax.lax.broadcasted_iota(jnp.int32, y.shape, 0) + i * seq_tile
        cols = jax.lax.broadcasted_iota(jnp.int32, y.shape, 1)
        idx = (rows * row_width + cols).astype(jnp.uint32)

        h = idx ^ seed_ref[0].astype(jnp.uint32)
        h = h * jnp.uint32(0x9E3779B1)
        h = h ^ (h >> 16)
        h = h * jnp.uint32(0x85EBCA6B)
        h = h ^ (h >> 13)
        h = h * jnp.uint32(0xC2B2AE35)
        h = h ^ (h >> 16)

        drop_thresh = jnp.uint32(int(dropout_p * 4294967296.0))
        keep = h >= drop_thresh
        y = jnp.where(keep, y * jnp.float32(1.0 / (1.0 - dropout_p)),
                      jnp.float32(0.0))

    o_ref[...] = y.astype(o_ref.dtype)


# ----------------------------------------------------------------------------
# Wrapper
# ----------------------------------------------------------------------------
def absolute_positional_encoding(x, pe, *, dropout_p: float = 0.1,
                                 training: bool = False, seed: int = 0,
                                 seq_tile: int | None = None,
                                 vmem_target_bytes: int = 4 * 1024 * 1024):
    """x: [S, B, D]; pe: [max_len, 1, D] (or [max_len, D])."""
    S, B, D = x.shape
    max_len = pe.shape[0]
    assert pe.shape[-1] == D and max_len >= S
    assert 0.0 <= dropout_p < 1.0

    pe2d = pe.reshape(max_len, D)          # drop singleton batch dim (free)
    row_width = B * D
    x2d = x.reshape(S, row_width)          # contiguous -> free reshape

    # Tile sizing: aim for ~vmem_target_bytes per x tile, multiple of 8 rows,
    # capped at the (8-rounded) sequence length.
    if seq_tile is None:
        row_bytes = row_width * x.dtype.itemsize
        seq_tile = max(8, (vmem_target_bytes // row_bytes) // 8 * 8)
    seq_tile = min(int(seq_tile), ((S + 7) // 8) * 8)
    seq_tile = max(8, (seq_tile // 8) * 8)

    grid = pl.cdiv(S, seq_tile)

    # Ensure pe has rows for every (possibly overhanging) grid block.
    needed = grid * seq_tile
    if needed > max_len:
        pe2d = jnp.pad(pe2d, ((0, needed - max_len), (0, 0)))

    kernel = functools.partial(
        _ape_kernel, batch=B, row_width=row_width, seq_tile=seq_tile,
        dropout_p=float(dropout_p), training=bool(training))

    out2d = pl.pallas_call(
        kernel,
        out_shape=jax.ShapeDtypeStruct((S, row_width), x.dtype),
        grid_spec=pltpu.PrefetchScalarGridSpec(
            num_scalar_prefetch=1,                 # dropout seed in SMEM
            grid=(grid,),
            in_specs=[
                pl.BlockSpec((seq_tile, row_width), lambda i, seed_ref: (i, 0)),
                pl.BlockSpec((seq_tile, D), lambda i, seed_ref: (i, 0)),
            ],
            out_specs=pl.BlockSpec((seq_tile, row_width),
                                   lambda i, seed_ref: (i, 0)),
        ),
        compiler_params=pltpu.CompilerParams(
            dimension_semantics=("parallel",),     # grid steps independent
            vmem_limit_bytes=48 * 1024 * 1024,     # safe on v5e/v6e/v7x
        ),
    )(jnp.asarray([seed], dtype=jnp.int32), x2d, pe2d)

    return out2d.reshape(S, B, D)


# ----------------------------------------------------------------------------
# Demo / correctness check
# ----------------------------------------------------------------------------
if __name__ == "__main__":
    SEQ, BATCH, D_MODEL, MAX_LEN = 16, 2, 32, 64

    key = jax.random.PRNGKey(0)
    x = jax.random.normal(key, (SEQ, BATCH, D_MODEL), dtype=jnp.float32)
    pe = make_positional_encoding(D_MODEL, MAX_LEN)

    ref = x + pe[:SEQ]   # broadcast over batch, same as the PyTorch forward

    # Eval mode (dropout = identity) — deterministic, matches PyTorch .eval().
    out = absolute_positional_encoding(x, pe, dropout_p=0.1, training=False)
    out = jax.block_until_ready(out)
    assert out.shape == (SEQ, BATCH, D_MODEL)
    assert out.dtype == x.dtype
    assert jnp.allclose(out, ref, atol=1e-6, rtol=1e-6), "eval mismatch"

    # Training mode: in-kernel hash-based inverted dropout (p = 0.1).
    out_train = absolute_positional_encoding(x, pe, dropout_p=0.1,
                                             training=True, seed=42)
    out_train = jax.block_until_ready(out_train)
    nz = out_train != 0.0
    assert jnp.allclose(jnp.where(nz, out_train, 0.0),
                        jnp.where(nz, ref / 0.9, 0.0),
                        atol=1e-5, rtol=1e-5), "train mismatch"

    print("KERNEL_OK")
</pallas_src>

<mosaic_0001>
module attributes {stable_mosaic.version = 11 : i64} {
  func.func @_ape_kernel(%arg0: i32, %arg1: memref<1xi32, #tpu.memory_space<smem>>, %arg2: memref<16x64xf32, #tpu.memory_space<vmem>>, %arg3: memref<16x32xf32, #tpu.memory_space<vmem>>, %arg4: memref<16x64xf32, #tpu.memory_space<vmem>>) attributes {dimension_semantics = [#tpu.dimension_semantics<parallel>], iteration_bounds = array<i64: 1>, scalar_prefetch = 1 : i64, scratch_operands = 0 : i64, tpu.core_type = #tpu.core_type<tc>, window_params = [{transform_indices = @transform_0, window_bounds = array<i64: 16, 64>}, {transform_indices = @transform_1, window_bounds = array<i64: 16, 32>}, {transform_indices = @transform_2, window_bounds = array<i64: 16, 64>}]} {
    %c0 = arith.constant 0 : index
    %c0_0 = arith.constant 0 : index
    %0 = vector.load %arg3[%c0, %c0_0] : memref<16x32xf32, #tpu.memory_space<vmem>>, vector<16x32xf32>
    %1 = tpu.concatenate %0, %0 in 1 : vector<16x32xf32>, vector<16x32xf32> -> vector<16x64xf32>
    %c0_1 = arith.constant 0 : index
    %c0_2 = arith.constant 0 : index
    %2 = vector.load %arg2[%c0_1, %c0_2] : memref<16x64xf32, #tpu.memory_space<vmem>>, vector<16x64xf32>
    %3 = arith.addf %2, %1 : vector<16x64xf32>
    %c0_3 = arith.constant 0 : index
    %c0_4 = arith.constant 0 : index
    %4 = vector.load %arg4[%c0_3, %c0_4] : memref<16x64xf32, #tpu.memory_space<vmem>>, vector<16x64xf32>
    tpu.vector_store %arg4[%c0_3, %c0_4], %3 {strides = array<i32>} : memref<16x64xf32, #tpu.memory_space<vmem>>, vector<16x64xf32>,
    return
  }
  func.func @transform_0(%arg0: i32, %arg1: memref<1xi32, #tpu.memory_space<smem>>) -> (i32, i32) {
    %c0_i32 = arith.constant 0 : i32
    %c0_i32_0 = arith.constant 0 : i32
    return %arg0, %c0_i32 : i32, i32
  }
  func.func @transform_1(%arg0: i32, %arg1: memref<1xi32, #tpu.memory_space<smem>>) -> (i32, i32) {
    %c0_i32 = arith.constant 0 : i32
    %c0_i32_0 = arith.constant 0 : i32
    return %arg0, %c0_i32 : i32, i32
  }
  func.func @transform_2(%arg0: i32, %arg1: memref<1xi32, #tpu.memory_space<smem>>) -> (i32, i32) {
    %c0_i32 = arith.constant 0 : i32
    %c0_i32_0 = arith.constant 0 : i32
    return %arg0, %c0_i32 : i32, i32
  }
}

</mosaic_0001>

<bundles_post_ra>
// kernel: tpu_custom_call.1
= control target key start
LH: loop header
LB: loop body
LE: loop exit
PB: predicated region body
PF: predicated region fallthrough
CT: control target
= control target key end

     0   :  { %s82_s14 = smov 32   ;;  %s121_s0 = inlined_call_operand.<no memory space> [shape: s32[1], index: 0, kind: input, shape index: {}]   ;;  %s122_s1 = inlined_call_operand.vmem [shape: f32[16,64], index: 1, kind: input, shape index: {}]   ;;  %s123_s2 = inlined_call_operand.vmem [shape: f32[64,32], index: 2, kind: input, shape index: {}]   ;;  %s124_s3 = inlined_call_operand.hbm [shape: f32[16,64], index: 3, kind: output, shape index: {}]  }
   0x1   :  { %v14_v0 = vld [vmem:[%s123_s2] sm:$0xff] }
   0x2   :  { %18 = vrot.lane.b32.xlu0 %v14_v0, %s82_s14 }
   0x3   :  { %9 = vsyncpa [#allocation5], 0  ;;  %v15_v1 = vld [vmem:[%s123_s2 + $0x8] sm:$0xff]  ;;  %vm24_vm0 = vcmask 261120   ;;  %v27_v2 = vld [vmem:[%s122_s1] sm:$0xff]  ;;  %vm31_vm1 = vcmask 523264  }
   0x4   :  { %s83_s18 = smov [#allocation4]   ;;  %s40_s22 = sshll.u32 %s124_s3, 4  ;;  %v28_v6 = vld [vmem:[%s122_s1 + $0x8] sm:$0xff]  ;;  %s41_s22 = int_to_ptr.hbm [resolvable:$true] %s40_s22 }
   0x5   :  { %s38_s19 = sshll.u32 %s83_s18, 4  ;;  %s84_s2 = smov 128   ;;  %s39_s19 = int_to_ptr.vmem [resolvable:$true] %s38_s19 }
   0x6   :  { %s85_s25 = smov 8  }
   0xa   :  { %20 = vrot.lane.b32.xlu0 %v15_v1, %s82_s14 }
  0x74   :  { %v19_v3 = vpop.permute.xlu0 %18 }
  0x75   :  { %v25_v4 = vsel %vm24_vm0, %v14_v0, %v19_v3 }
  0x76   :  { %v29_v5 = vadd.f32 %v27_v2, %v25_v4 }
  0x78   :  { %32 = vst.msk [vmem:[#allocation4] sm:$0xff] %vm31_vm1, %v29_v5 }
  0x7c   :  { %v21_v7 = vpop.permute.xlu0 %20 }
  0x7d   :  { %v26_v8 = vsel %vm24_vm0, %v15_v1, %v21_v7 }
  0x7e   :  { %v30_v9 = vadd.f32 %v28_v6, %v26_v8 }
  0x80   :  { %33 = vst.msk [vmem:[#allocation4 + $0x8] sm:$0xff] %vm31_vm1, %v30_v9 }
  0x81   :  { %46 = dma.vmem_to_hbm [thread:$0]  %s39_s19, 256, %s41_s22, [#allocation5], %s84_s2, %s84_s2, %s85_s25  }
  0x82   :  { %80 = dma.done.wait [#allocation5], 256  }
  0x83   :  { %81 = vsyncadd [#allocation5], 4294967040 }
  0x84   :  { %51 = vsyncpa [#allocation5], 1 }

</bundles_post_ra>
